<compile_context>
chip_gen: v7x
topology: tpu7x:2x2x1
jax: 0.10.0
libtpu: 0.0.40
codegen_flags: <defaults>
</compile_context>

<pallas_src>
import jax
import jax.numpy as jnp
from jax.experimental import pallas as pl
from jax.experimental.pallas import tpu as pltpu


# ----------------------------------------------------------------------------
# Trace-time helpers (Python ints only).
# ----------------------------------------------------------------------------
def _round_up(x, m):
    return ((x + m - 1) // m) * m


def _round_down(x, m):
    return (x // m) * m


def _vmem_caps():
    """(vmem_limit_bytes, tile_working_set_budget) for the current TPU generation."""
    cap = 64 << 20                       # conservative default (v7x per-core VMEM)
    try:
        info = pltpu.get_tpu_info()
        cap = int(getattr(info, "vmem_capacity_bytes", cap) or cap)
    except Exception:
        pass
    cap = max(32 << 20, min(cap, 128 << 20))
    vmem_limit = max(32 << 20, min(int(cap * 0.75), 96 << 20))   # v5e/v6e ~96 MiB, v7x ~48 MiB
    tile_budget = min(int(cap * 0.40), 40 << 20)                 # double-buffered working set cap
    return vmem_limit, tile_budget


def _pick_lane_tile(l, c_in, c_out, itemsize, tile_budget, n_batch):
    """Fixed 128-multiple lane tile over L = T*V (pl.cdiv grid; ragged last block OK)."""
    # Target ~4 MiB input slab per grid step (amortizes ~0.35us/step overhead),
    # clamped to [512, 8192] lanes and to the double-buffered VMEM budget.
    target = max(512, min(8192, (4 << 20) // max(1, c_in * itemsize)))
    cap = tile_budget // max(1, 2 * (c_in + c_out) * itemsize)
    tl = max(128, min(target, cap))
    tl = _round_down(tl, 128)
    tl = min(tl, _round_up(l, 128))
    # v7x megacore: if the batch axis is degenerate, keep >= 2 lane tiles.
    if n_batch == 1 and tl >= l and l > 128:
        tl = _round_up(pl.cdiv(l, 2), 128)
    return max(128, tl)


# ----------------------------------------------------------------------------
# Branch 1: c_in > c_out  ->  1x1 conv as per-batch (c_out,c_in) @ (c_in, T*V) + bias.
# ----------------------------------------------------------------------------
def _conv1x1_kernel(x_ref, w_ref, b_ref, o_ref):
    # x_ref: (1, c_in, tl), w_ref: (c_out, c_in), b_ref: (c_out, 1), o_ref: (1, c_out, tl)
    acc = jnp.dot(w_ref[...], x_ref[0], preferred_element_type=jnp.float32)
    o_ref[0] = (acc + b_ref[...]).astype(o_ref.dtype)


def conv1x1(x_nchw, weight, bias):
    """x_nchw: (N, C_in, T, V); weight: (C_out, C_in); bias: (C_out,)."""
    n, c_in, t, v = x_nchw.shape
    c_out = weight.shape[0]
    l = t * v
    itemsize = jnp.dtype(x_nchw.dtype).itemsize
    vmem_limit, tile_budget = _vmem_caps()
    tl = _pick_lane_tile(l, c_in, c_out, itemsize, tile_budget, n)

    x3 = x_nchw.reshape(n, c_in, l)                 # free row-major reshape
    b2 = bias.reshape(c_out, 1).astype(jnp.float32)

    out3 = pl.pallas_call(
        _conv1x1_kernel,
        out_shape=jax.ShapeDtypeStruct((n, c_out, l), x_nchw.dtype),
        grid=(n, pl.cdiv(l, tl)),
        in_specs=[
            pl.BlockSpec((1, c_in, tl), lambda i, j: (i, 0, j)),
            pl.BlockSpec((c_out, c_in), lambda i, j: (0, 0)),   # resident weight
            pl.BlockSpec((c_out, 1), lambda i, j: (0, 0)),      # resident bias
        ],
        out_specs=pl.BlockSpec((1, c_out, tl), lambda i, j: (i, 0, j)),
        compiler_params=pltpu.CompilerParams(
            dimension_semantics=("parallel", "parallel"),
            vmem_limit_bytes=vmem_limit),
    )(x3, weight, b2)
    return out3.reshape(n, c_out, t, v)             # free reshape


# ----------------------------------------------------------------------------
# Branch 2: c_in < c_out  ->  channel zero-pad, tiled over (N, T*V).
# ----------------------------------------------------------------------------
def _pad_channels_kernel(x_ref, o_ref):
    # x_ref: (1, c_in, tl), o_ref: (1, c_out, tl); disjoint-slice stores.
    c_in = x_ref.shape[1]
    c_out = o_ref.shape[1]
    tl = o_ref.shape[2]
    o_ref[0, :c_in, :] = x_ref[0]
    o_ref[0, c_in:, :] = jnp.zeros((c_out - c_in, tl), o_ref.dtype)


def pad_channels(x_nchw, c_out):
    n, c_in, t, v = x_nchw.shape
    l = t * v
    itemsize = jnp.dtype(x_nchw.dtype).itemsize
    vmem_limit, tile_budget = _vmem_caps()
    tl = _pick_lane_tile(l, c_in, c_out, itemsize, tile_budget, n)

    x3 = x_nchw.reshape(n, c_in, l)                 # free reshape

    out3 = pl.pallas_call(
        _pad_channels_kernel,
        out_shape=jax.ShapeDtypeStruct((n, c_out, l), x_nchw.dtype),
        grid=(n, pl.cdiv(l, tl)),
        in_specs=[pl.BlockSpec((1, c_in, tl), lambda i, j: (i, 0, j))],
        out_specs=pl.BlockSpec((1, c_out, tl), lambda i, j: (i, 0, j)),
        compiler_params=pltpu.CompilerParams(
            dimension_semantics=("parallel", "parallel"),
            vmem_limit_bytes=vmem_limit),
    )(x3)
    return out3.reshape(n, c_out, t, v)


# ----------------------------------------------------------------------------
# Branch 3: c_in == c_out  ->  MaxPool2d((kt,1), stride=(kt,1)) over T.
# ----------------------------------------------------------------------------
def _maxpool_kernel(x_ref, o_ref):
    # x_ref: (tm, t_out, kt*V), o_ref: (tm, t_out, V)
    v = o_ref.shape[2]
    kt = x_ref.shape[2] // v
    acc = x_ref[:, :, 0:v]
    for k in range(1, kt):                          # static unroll, contiguous lane slices
        acc = jnp.maximum(acc, x_ref[:, :, k * v:(k + 1) * v])
    o_ref[...] = acc


# TODO(synk): for V << 128 the output store stays lane-sparse (masked vst); packing
# t_out*V into the lane axis needs an in-kernel cross-lane relayout and is left out
# for compile robustness (the kernel remains DMA-bound, not store-limited, at kt<=4).
def maxpool_t(x_nchw, kt):
    if kt == 1:
        return x_nchw  # MaxPool2d((1,1), stride=(1,1)) is the identity
    n, c, t, v = x_nchw.shape
    t_out = t // kt
    assert t_out >= 1, "MaxPool2d window larger than the temporal extent"
    if t_out * kt != t:
        x_nchw = x_nchw[:, :, : t_out * kt, :]      # PyTorch floor-truncation of T
    m = n * c
    itemsize = jnp.dtype(x_nchw.dtype).itemsize
    vmem_limit, tile_budget = _vmem_caps()

    # HBM-side block target ~4 MiB; the VMEM budget accounts for lane padding of
    # kt*V and V to 128 lanes plus double buffering of input + output blocks.
    hbm_row = t_out * kt * v * itemsize
    vmem_row = _round_up(t_out, 8) * (_round_up(kt * v, 128) + _round_up(v, 128)) * itemsize
    tm = min((4 << 20) // max(1, hbm_row), tile_budget // max(1, 2 * vmem_row))
    tm = max(1, min(tm, m))
    if tm >= 8:
        tm = _round_down(tm, 8)
    if tm >= m and m >= 2:                          # keep >= 2 row tiles for megacore (v7x)
        tm = pl.cdiv(m, 2)

    x3 = x_nchw.reshape(m, t_out, kt * v)           # free row-major reshape

    out3 = pl.pallas_call(
        _maxpool_kernel,
        out_shape=jax.ShapeDtypeStruct((m, t_out, v), x_nchw.dtype),
        grid=(pl.cdiv(m, tm),),
        in_specs=[pl.BlockSpec((tm, t_out, kt * v), lambda i: (i, 0, 0))],
        out_specs=pl.BlockSpec((tm, t_out, v), lambda i: (i, 0, 0)),
        compiler_params=pltpu.CompilerParams(
            dimension_semantics=("parallel",),
            vmem_limit_bytes=vmem_limit),
    )(x3)
    return out3.reshape(n, c, t_out, v)


# ----------------------------------------------------------------------------
# Align module: parameter init + branch dispatch (mirrors the PyTorch forward).
# ----------------------------------------------------------------------------
def init_align_params(key, c_in, c_out):
    """Only the c_in > c_out branch owns parameters (the 1x1 conv)."""
    if c_in > c_out:
        kw, kb = jax.random.split(key)
        bound = 1.0 / (c_in ** 0.5)                 # conv kernel is 1x1 -> fan_in = c_in
        weight = jax.random.uniform(kw, (c_out, c_in), jnp.float32, -bound, bound)
        bias = jax.random.uniform(kb, (c_out,), jnp.float32, -bound, bound)
        return {"weight": weight, "bias": bias}
    return {}


def align_forward(x, params, c_in, c_out, kt=1):
    assert x.shape[1] == c_in
    if c_in > c_out:
        return conv1x1(x, params["weight"], params["bias"])
    if c_in < c_out:
        return pad_channels(x, c_out)
    return maxpool_t(x, kt)


# ----------------------------------------------------------------------------
# Pure-JAX references (exact f32 math, no matmul-precision ambiguity).
# ----------------------------------------------------------------------------
def align_ref(x, params, c_in, c_out, kt=1):
    if c_in > c_out:
        w, b = params["weight"], params["bias"]
        y = (w[None, :, :, None, None] * x[:, None, :, :, :]).sum(axis=2)
        return (y + b[None, :, None, None]).astype(x.dtype)
    if c_in < c_out:
        return jnp.pad(x, ((0, 0), (0, c_out - c_in), (0, 0), (0, 0)))
    n, c, t, v = x.shape
    t_out = t // kt
    xt = x[:, :, : t_out * kt, :]
    return xt.reshape(n, c, t_out, kt, v).max(axis=3)


if __name__ == "__main__":
    key = jax.random.PRNGKey(0)
    k1, k2, k3, kw, kb = jax.random.split(key, 5)

    N, T, V = 2, 8, 16   # T*V = 128 -> lane-dense slabs at smoke-test size

    # --- Branch 1: c_in > c_out -> 1x1 conv (channel matmul + bias) ---------
    c_in, c_out = 8, 4
    # Quantized values make every MXU product exactly representable, so the check
    # is independent of the hardware matmul precision mode.
    x1 = jnp.round(jax.random.normal(k1, (N, c_in, T, V), jnp.float32) * 4.0) / 4.0
    bound = 1.0 / (c_in ** 0.5)
    w = jnp.round(jax.random.uniform(kw, (c_out, c_in), jnp.float32, -bound, bound) * 32.0) / 32.0
    b = jnp.round(jax.random.uniform(kb, (c_out,), jnp.float32, -bound, bound) * 32.0) / 32.0
    p1 = {"weight": w, "bias": b}
    y1 = jax.block_until_ready(align_forward(x1, p1, c_in, c_out))
    r1 = align_ref(x1, p1, c_in, c_out)
    assert y1.shape == (N, c_out, T, V)
    assert jnp.allclose(y1, r1, atol=1e-6, rtol=1e-6)

    # --- Branch 2: c_in < c_out -> channel zero-pad --------------------------
    c_in, c_out = 4, 8
    x2 = jax.random.normal(k2, (N, c_in, T, V), jnp.float32)
    y2 = jax.block_until_ready(align_forward(x2, {}, c_in, c_out))
    assert y2.shape == (N, c_out, T, V)
    assert jnp.allclose(y2, align_ref(x2, {}, c_in, c_out))

    # --- Branch 3: c_in == c_out -> temporal max-pool -------------------------
    c_in = c_out = 4
    x3 = jax.random.normal(k3, (N, c_in, T, V), jnp.float32)
    y3 = jax.block_until_ready(align_forward(x3, {}, c_in, c_out, kt=1))   # identity path
    assert jnp.allclose(y3, align_ref(x3, {}, c_in, c_out, kt=1))
    y3b = jax.block_until_ready(align_forward(x3, {}, c_in, c_out, kt=2))  # even window
    assert y3b.shape == (N, c_out, T // 2, V)
    assert jnp.allclose(y3b, align_ref(x3, {}, c_in, c_out, kt=2))
    y3c = jax.block_until_ready(align_forward(x3, {}, c_in, c_out, kt=3))  # T % kt != 0 (floor-trunc)
    assert y3c.shape == (N, c_out, T // 3, V)
    assert jnp.allclose(y3c, align_ref(x3, {}, c_in, c_out, kt=3))

    print("KERNEL_OK")
</pallas_src>

<mosaic_0001>
module attributes {stable_mosaic.version = 11 : i64} {
  func.func @_conv1x1_kernel(%arg0: i32, %arg1: i32, %arg2: memref<1x8x128xf32, #tpu.memory_space<vmem>>, %arg3: memref<4x8xf32, #tpu.memory_space<vmem>>, %arg4: memref<4x1xf32, #tpu.memory_space<vmem>>, %arg5: memref<1x4x128xf32, #tpu.memory_space<vmem>>) attributes {dimension_semantics = [#tpu.dimension_semantics<parallel>, #tpu.dimension_semantics<parallel>], iteration_bounds = array<i64: 2, 1>, scalar_prefetch = 0 : i64, scratch_operands = 0 : i64, tpu.core_type = #tpu.core_type<tc>, window_params = [{transform_indices = @transform_0, window_bounds = array<i64: 1, 8, 128>}, {pipeline_mode = #tpu.pipeline_mode<synchronous>, transform_indices = @transform_1, window_bounds = array<i64: 4, 8>}, {pipeline_mode = #tpu.pipeline_mode<synchronous>, transform_indices = @transform_2, window_bounds = array<i64: 4, 1>}, {transform_indices = @transform_3, window_bounds = array<i64: 1, 4, 128>}]} {
    %c0 = arith.constant 0 : index
    %c0_0 = arith.constant 0 : index
    %0 = vector.load %arg3[%c0, %c0_0] : memref<4x8xf32, #tpu.memory_space<vmem>>, vector<4x8xf32>
    %c0_1 = arith.constant 0 : index
    %c0_2 = arith.constant 0 : index
    %c0_3 = arith.constant 0 : index
    %1 = vector.load %arg2[%c0_1, %c0_2, %c0_3] : memref<1x8x128xf32, #tpu.memory_space<vmem>>, vector<1x8x128xf32>
    %2 = vector.shape_cast %1 : vector<1x8x128xf32> to vector<8x128xf32>
    %cst = arith.constant dense<0.000000e+00> : vector<4x128xf32>
    %3 = tpu.matmul %0, %2, %cst {dimension_numbers = #tpu.dot_dimension_numbers<[1], [0], [0], [1], [0, 0, 1, 1], [], []>} : vector<4x8xf32>, vector<8x128xf32>, vector<4x128xf32> -> vector<4x128xf32>
    %c0_4 = arith.constant 0 : index
    %c0_5 = arith.constant 0 : index
    %4 = vector.load %arg4[%c0_4, %c0_5] : memref<4x1xf32, #tpu.memory_space<vmem>>, vector<4x1xf32>
    %5 = vector.broadcast %4 : vector<4x1xf32> to vector<4x128xf32>
    %6 = arith.addf %3, %5 : vector<4x128xf32>
    %c0_6 = arith.constant 0 : index
    %c0_7 = arith.constant 0 : index
    %c0_8 = arith.constant 0 : index
    %7 = vector.load %arg5[%c0_6, %c0_7, %c0_8] : memref<1x4x128xf32, #tpu.memory_space<vmem>>, vector<1x4x128xf32>
    %8 = vector.shape_cast %7 : vector<1x4x128xf32> to vector<4x128xf32>
    %9 = vector.shape_cast %6 : vector<4x128xf32> to vector<1x4x128xf32>
    tpu.vector_store %arg5[%c0_6, %c0_7, %c0_8], %9 {strides = array<i32>} : memref<1x4x128xf32, #tpu.memory_space<vmem>>, vector<1x4x128xf32>,
    return
  }
  func.func @transform_0(%arg0: i32, %arg1: i32) -> (i32, i32, i32) {
    %c0_i32 = arith.constant 0 : i32
    %c0_i32_0 = arith.constant 0 : i32
    return %arg0, %c0_i32, %arg1 : i32, i32, i32
  }
  func.func @transform_1(%arg0: i32, %arg1: i32) -> (i32, i32) {
    %c0_i32 = arith.constant 0 : i32
    %c0_i32_0 = arith.constant 0 : i32
    %c0_i32_1 = arith.constant 0 : i32
    return %c0_i32, %c0_i32_0 : i32, i32
  }
  func.func @transform_2(%arg0: i32, %arg1: i32) -> (i32, i32) {
    %c0_i32 = arith.constant 0 : i32
    %c0_i32_0 = arith.constant 0 : i32
    %c0_i32_1 = arith.constant 0 : i32
    return %c0_i32, %c0_i32_0 : i32, i32
  }
  func.func @transform_3(%arg0: i32, %arg1: i32) -> (i32, i32, i32) {
    %c0_i32 = arith.constant 0 : i32
    %c0_i32_0 = arith.constant 0 : i32
    return %arg0, %c0_i32, %arg1 : i32, i32, i32
  }
}

</mosaic_0001>

<bundles_post_ra>
// kernel: tpu_custom_call.1
= control target key start
LH: loop header
LB: loop body
LE: loop exit
PB: predicated region body
PF: predicated region fallthrough
CT: control target
= control target key end

     0   :  { %8 = vsyncpa [#allocation3], 0  ;;  %s786_s0 = inlined_call_operand.hbm [shape: f32[2,8,128], index: 0, kind: input, shape index: {}]   ;;  %s787_s1 = inlined_call_operand.vmem [shape: f32[4,8], index: 1, kind: input, shape index: {}]   ;;  %s788_s2 = inlined_call_operand.vmem [shape: f32[4,1], index: 2, kind: input, shape index: {}]   ;;  %s789_s3 = inlined_call_operand.hbm [shape: f32[2,4,128], index: 3, kind: output, shape index: {}]  }
   0x1   :  { %10 = vsyncpa [#allocation3 + $0x1], 0 }
   0x2   :  { %11 = vsyncpa [#allocation4], 0 }
   0x3   :  { %13 = vsyncpa [#allocation4 + $0x1], 0  ;;  %s607_s12 = smov 0   ;;  %s609_s13 = smov 0  }
   0x4   :  { %s611_s14 = smov 0   ;;  %s613_s15 = smov 0  }
   0x5   :  { %s615_s16 = smov 0   ;;  %s617_s17 = smov 0  }
   0x6 LB: > { %s381_s18 = sadd.s32 4294967295, %s580_s17   ;;  %s382_s19 = sadd.s32 4294967294, %s580_s17   ;;  %s580_s17 = sphi %s617_s17, %s19_s17   ;;  %s576_s16 = sphi %s615_s16, %s805_s16   ;;  %s572_s15 = sphi %s613_s15, %s804_s15   ;;  %s568_s14 = sphi %s611_s14, %s803_s14   ;;  %s564_s13 = sphi %s609_s13, %s802_s13   ;;  %s560_s12 = sphi %s607_s12, %s801_s12  }
   0x7   : > { %s31_s20 = sadd.s32 1, %s576_s16  ;;  %s40_s21 = sadd.s32 1, %s568_s14 }
   0x8   : > { %p33_p0 = scmp.ge.s32.totalorder %s31_s20, 2  ;;  %p47_p1 = scmp.ne.s32.totalorder %s568_s14, %s564_s13 }
   0x9   : > { %p48_p2 = scmp.eq.s32.totalorder %s580_s17, 0  ;;  %p53_p3 = scmp.ne.s32.totalorder %s564_s13, %s560_s12 }
   0xa   : > { %s807_s20 = smov (%p33_p0, %s31_s20), 0  ;;  %p54_p5 = scmp.eq.s32.totalorder %s381_s18, 0 }
   0xb   : > { %p648_p4 = por %p48_p2, %p47_p1  ;;  %s35_s23 = ssub.s32 %s576_s16, %s807_s20 }
   0xc   : > { %p121_p6 = scmp.eq.s32.totalorder %s381_s18, 1  ;;  %p38_p7 = scmp.eq.s32.totalorder %s35_s23, 0 }
   0xd   : > { %p654_p8 = por %p54_p5, %p53_p3  ;;  %p127_p10 = scmp.eq.s32.totalorder %s382_s19, 1 }
   0xe   : > { %p658_p9 = por %p121_p6, %p47_p1  ;;  %p414_p13 = scmp.lt.s32.totalorder %s580_s17, 2 }
   0xf   : > { %s663_s26 = scalar_select %p38_p7, %s568_s14, %s40_s21  }
  0x10   : > { %s793_s25 = scalar_select %p658_p9, 1, 0 }
  0x11   : > { %p665_p11 = por %p127_p10, %p53_p3  ;;  %s153_s28 = sand.u32 1, %s568_s14  }
  0x12   : > { %s385_s29 = sshll.u32 %s153_s28, 3  ;;  %s386_s30 = sshll.u32 %s576_s16, 7 }
  0x13   : > { %s794_s27 = scalar_select %p665_p11, 1, 0 }
  0x14   : > { %s676_s6 = scalar_lea.hbm %s786_s0, %s386_s30  ;;  %s157_s7 = scalar_lea.vmem [#allocation2], %s385_s29 }
  0x15   : > { %s165_s8 = sshll.u32 %s157_s7, 4  ;;  %p682_p0 = pnand %p414_p13, %p648_p4  ;;  %s678_s8 = int_to_ptr.vmem [resolvable:$true] %s165_s8 }
  0x16   : > { %s154_s10 = scalar_lea.sflag [#allocation3], %s153_s28  ;;  %s468_s11 = scalar_lea.hbm %s676_s6, 128 }
  0x17   : > { %p469_p3 = scmp.ne.s32.totalorder %s676_s6, %s468_s11  ;;  %p470_p5 = pneg %p682_p0 }
  0x18   : > { %s473_s21 = scalar_lea.hbm %s786_s0, 256  ;;  %p474_p4 = scmp.lt.u32.totalorder %s676_s6, %s786_s0 }
  0x19   : > { %p471_p6 = pnand %p470_p5, %p469_p3  ;;  %p475_p10 = scmp.lt.u32.totalorder %s473_s21, %s468_s11 }
  0x1a   : > { %p477_p12 = scmp.lt.u32.totalorder %s468_s11, %s676_s6 }
  0x1b   : > { %p472_p7 = pneg %p471_p6  ;;  %p476_p13 = por %p475_p10, %p474_p4 }
  0x1d   : > { %p478_p1 = por %p477_p12, %p476_p13 }
  0x1f   : > { %p479_p2 = pnand %p478_p1, %p472_p7 }
  0x21   : > { %482 = shalt.err (!%p479_p2)
}
  0x22   : > { %s483_s28 = scalar_lea.vmem %s678_s8, 128  ;;  %s582_s29 = smov [#allocation2]  }
  0x23   : > { %p484_p3 = scmp.ne.s32.totalorder %s678_s8, %s483_s28  ;;  %s488_s30 = sshll.u32 %s582_s29, 4  ;;  %s489_s30 = int_to_ptr.vmem [resolvable:$false] %s488_s30 }
  0x24   : > { %s490_s4 = scalar_lea.vmem %s489_s30, 256  ;;  %p491_p9 = scmp.lt.s32.totalorder %s678_s8, %s489_s30 }
  0x25   : > { %p486_p6 = pnand %p484_p3, %p470_p5  ;;  %p492_p4 = scmp.lt.s32.totalorder %s490_s4, %s483_s28 }
  0x27   : > { %p487_p11 = pneg %p486_p6  ;;  %p493_p10 = por %p492_p4, %p491_p9 }
  0x29   : > { %p494_p12 = pnand %p493_p10, %p487_p11 }
  0x2b   : > { %497 = shalt.err (!%p494_p12)
}
  0x2c   : > { %409 = dma.hbm_to_vmem [thread:$0]  (!%p682_p0), %s676_s6, 128, %s678_s8, %s154_s10  }
  0x2d   : > { %p796_p1 = scmp.lt.s32.totalorder %s580_s17, 3  ;;  %p797_p2 = scmp.ge.s32.totalorder %s580_s17, 1 }
  0x2f   : > { %p171_p5 = pnand %p797_p2, %p796_p1 }
  0x30   : > { %s718_s5 = sand.u32 (!%p171_p5), 1, %s564_s13  }
  0x31   : > { %174 = sbr.rel (%p171_p5) target bundleno = 288 (0x120), region = 32  ;;  %s388_s7 = sshll.u32 (!%p171_p5), %s718_s5, 3 }
  0x32   : > { %s177_s11 = scalar_lea.sflag (!%p171_p5), [#allocation3], %s718_s5  ;;  %s180_s18 = scalar_lea.vmem (!%p171_p5), [#allocation2], %s388_s7 }
  0x38   : > { %551 = dma.done.wait (%p654_p8), %s177_s11, 128  }
  0x39   : > { %553 = vsyncadd (%p654_p8), %s177_s11, 4294967168  ;;  %v583_v0 = vmov 0.0   ;;  %vm584_vm0 = vmmov 0   ;;  %v585_v1 = vmov 0   ;;  %vm211_vm1 = vcmask 64512   ;;  %v204_v2 = vld [vmem:[%s180_s18] sm:$0xff] }
  0x3a   : > { %397 = vmatprep.subr.mxu0 %v583_v0  ;;  %399 = vmatprep.mubr.msk.f32.mxu0 %vm584_vm0, %v583_v0  ;;  %v203_v3 = vld [vmem:[%s787_s1] sm:$0xf]  ;;  %s389_s24 = sshll.u32 %s718_s5, 2  ;;  %s392_s19 = sshll.u32 %s572_s15, 6 }
  0x3b   : > { %467 = vset.pattern.permute.xlu0 %v585_v1  ;;  %v205_v4 = vld [vmem:[%s788_s2] sm:$0xf]  ;;  %398 = vmatpush3.msra.mxu0 %v204_v2  ;;  %s202_s21 = scalar_lea.vmem [#allocation5], %s389_s24  ;;  %s737_s29 = scalar_lea.hbm %s789_s3, %s392_s19 }
  0x3c   : > { %208 = vperm.xlu0 %467, %v205_v4   ;;  %400 = vmatmul.mubr.msk.f32.vlgmr.msra.gmra.mrb[0].mxu0 %vm211_vm1, %v203_v3  ;;  %s301_s22 = sshll.u32 %s202_s21, 4  ;;  %s287_s30 = scalar_lea.sflag [#allocation4], %s718_s5  ;;  %s739_s22 = int_to_ptr.vmem [resolvable:$true] %s301_s22 }
  0x3d   : > { %s498_s4 = scalar_lea.vmem %s739_s22, 64  ;;  %p798_p9 = scmp.ne.s32.totalorder %s793_s25, 0 }
  0x3e   : > { %p499_p8 = scmp.ne.s32.totalorder %s739_s22, %s498_s4  ;;  %s586_s15 = smov [#allocation5]  }
  0x3f   : > { %s502_s7 = sshll.u32 %s586_s15, 4  ;;  %s503_s7 = int_to_ptr.vmem [resolvable:$false] %s502_s7 }
  0x40   : > { %p500_p11 = pnand %p499_p8, %p798_p9  ;;  %s504_s11 = scalar_lea.vmem %s503_s7, 128 }
  0x41   : > { %p505_p7 = scmp.lt.s32.totalorder %s739_s22, %s503_s7  ;;  %p506_p13 = scmp.lt.s32.totalorder %s504_s11, %s498_s4 }
  0x42   : > { %p501_p0 = pneg %p500_p11 }
  0x43   : > { %p507_p3 = por %p506_p13, %p505_p7 }
  0x45   : > { %p508_p6 = pnand %p507_p3, %p501_p0 }
  0xbb   : > { %v209_v5 = vpop.permute.xlu0 %208 }
 0x10f   : > { %v281_v6 = vpop.f32.mrb[0].mxu0 }
 0x110   : > { %v282_v7 = vadd.f32 %v281_v6, %v209_v5  ;;  %v401_v8 = vpop.f32.mrb[1].mxu0 }
 0x112   : > { %285 = vst [vmem:[%s202_s21] sm:$0xf] %v282_v7 }
 0x113   : > { %511 = shalt.err (!%p508_p6)
}
 0x114   : > { %s512_s5 = scalar_lea.hbm %s737_s29, 64  ;;  %s516_s8 = scalar_lea.hbm %s789_s3, 128 }
 0x115   : > { %p513_p4 = scmp.ne.s32.totalorder %s737_s29, %s512_s5  ;;  %p517_p1 = scmp.lt.u32.totalorder %s737_s29, %s789_s3 }
 0x116   : > { %p518_p2 = scmp.lt.u32.totalorder %s516_s8, %s512_s5  ;;  %p520_p8 = scmp.lt.u32.totalorder %s512_s5, %s737_s29 }
 0x117   : > { %p514_p10 = pnand %p513_p4, %p798_p9 }
 0x118   : > { %p519_p5 = por %p518_p2, %p517_p1 }
 0x119   : > { %p515_p12 = pneg %p514_p10 }
 0x11a   : > { %p521_p11 = por %p520_p8, %p519_p5 }
 0x11c   : > { %p522_p0 = pnand %p521_p11, %p515_p12 }
 0x11e   : > { %525 = shalt.err (!%p522_p0)
}
 0x11f   : > { %404 = dma.vmem_to_hbm [thread:$0]  (%p798_p9), %s739_s22, 64, %s737_s29, %s287_s30  }
 0x120 PF: > { %s313_s24 = sand.u32 1, %s560_s12   ;;  %p799_p7 = scmp.ne.s32.totalorder %s794_s27, 0 }
 0x121   : > { %p800_p13 = scmp.ge.s32.totalorder %s580_s17, 2  ;;  %s314_s19 = scalar_lea.sflag [#allocation4], %s313_s24 }
 0x123   : > { %p411_p3 = pnand %p800_p13, %p799_p7 }
 0x125   : > { %555 = dma.done.wait (!%p411_p3), %s314_s19, 64  }
 0x126   : > { %557 = vsyncadd (!%p411_p3), %s314_s19, 4294967232  ;;  %s19_s17 = sadd.s32 1, %s580_s17   ;;  %s801_s12 = smov %s564_s13 }
 0x127   : > { %p16_p6 = scmp.ge.s32.totalorder %s19_s17, 4   ;;  %s802_s13 = smov %s568_s14 }
 0x128   : > { %s803_s14 = smov %s663_s26  ;;  %s804_s15 = smov %s576_s16 }
 0x129   : > { %s805_s16 = smov %s807_s20  ;;  %18 = sbr.rel (!%p16_p6) target bundleno = 6 (0x6), region = 77 }
 0x130   :  { %319 = vsyncpa [#allocation3], 1 }
 0x131   :  { %321 = vsyncpa [#allocation3 + $0x1], 1 }
 0x132   :  { %322 = vsyncpa [#allocation4], 1 }
 0x133   :  { %324 = vsyncpa [#allocation4 + $0x1], 1 }

</bundles_post_ra>
